<compile_context>
chip_gen: v7x
topology: tpu7x:2x2x1
jax: 0.10.0
libtpu: 0.0.40
codegen_flags: <defaults>
</compile_context>

<pallas_src>
import jax
import jax.numpy as jnp
import numpy as np
from jax.experimental import pallas as pl
from jax.experimental.pallas import tpu as pltpu

_LANES = 128           # vreg lane width (identical on v5e / v6e / v7x)
_MAX_TILE_ROWS = 2048  # 1 MiB f32 per buffer -> ~4 MiB double-buffered in+out


def _affine_kernel(x_ref, o_ref):
    # Elementwise hot path: y = 2*x - 1, computed in f32, stored in out dtype.
    xf = x_ref[...].astype(jnp.float32)
    o_ref[...] = (2.0 * xf - 1.0).astype(o_ref.dtype)


def _round_up(n: int, m: int) -> int:
    return ((n + m - 1) // m) * m


def _sublane_multiple(dtype) -> int:
    # Min second-to-last-dim tile granularity: 8 for 4-byte, 16 for 2-byte,
    # 32 for 1-byte dtypes.
    itemsize = np.dtype(dtype).itemsize
    return 8 * max(1, 4 // max(itemsize, 1))


def _choose_tile_rows(rows: int, sub: int) -> int:
    """Pick a tile height: balanced across 2 TCs (v7x), capped for VMEM."""
    if rows <= _MAX_TILE_ROWS:
        half = _round_up(-(-rows // 2), sub)     # ceil(rows/2), sublane-aligned
        return half if half < rows else rows     # full-extent block if tiny
    # rows > cap: use an even number of tiles so both v7x cores get equal work.
    n_pairs = -(-rows // (2 * _MAX_TILE_ROWS))
    tile = _round_up(-(-rows // (2 * n_pairs)), sub)
    return min(tile, _MAX_TILE_ROWS)


@jax.jit
def attribute_classifier_forward(x):
    """x: (batch, 1, 1, 40) -> same semantics as `2 * x.squeeze() - 1`.

    batch > 1  -> (batch, 40);  batch == 1 -> (40,)  (torch .squeeze()).
    """
    orig_dtype = x.dtype
    squeezed_shape = tuple(d for d in x.shape if d != 1)  # torch .squeeze()
    total = int(x.size)

    # ---- zero-copy 2-D view ----
    if total % _LANES == 0:
        rows, cols = total // _LANES, _LANES      # lane-dense, free bitcast
    else:
        cols = x.shape[-1]                        # (batch, 40)-style view
        rows = total // cols
    x2d = jnp.reshape(x, (rows, cols))

    sub = _sublane_multiple(orig_dtype)
    tile_rows = _choose_tile_rows(rows, sub)
    grid = (pl.cdiv(rows, tile_rows),)            # partial last block is fine

    out2d = pl.pallas_call(
        _affine_kernel,
        out_shape=jax.ShapeDtypeStruct((rows, cols), orig_dtype),
        grid=grid,
        in_specs=[pl.BlockSpec((tile_rows, cols), lambda i: (i, 0))],
        out_specs=pl.BlockSpec((tile_rows, cols), lambda i: (i, 0)),
        compiler_params=pltpu.CompilerParams(
            dimension_semantics=(pltpu.PARALLEL,)),
    )(x2d)

    # No padding was added, so this reshape is also a pure bitcast.
    return jnp.reshape(out2d, squeezed_shape)


if __name__ == "__main__":
    key = jax.random.PRNGKey(0)

    # Primary small shape consistent with the module spec: (batch, 1, 1, 40).
    batch = 2
    x = jax.random.uniform(key, (batch, 1, 1, 40), dtype=jnp.float32)
    y = attribute_classifier_forward(x)
    jax.block_until_ready(y)
    ref = 2.0 * jnp.squeeze(x) - 1.0
    assert y.shape == ref.shape == (batch, 40), (y.shape, ref.shape)
    assert jnp.allclose(y, ref, atol=1e-6), "mismatch vs reference (batch=2)"

    # batch == 1: torch .squeeze() drops all singleton dims -> (40,).
    x1 = jax.random.uniform(jax.random.PRNGKey(1), (1, 1, 1, 40),
                            dtype=jnp.float32)
    y1 = attribute_classifier_forward(x1)
    jax.block_until_ready(y1)
    ref1 = 2.0 * jnp.squeeze(x1) - 1.0
    assert y1.shape == ref1.shape == (40,), (y1.shape, ref1.shape)
    assert jnp.allclose(y1, ref1, atol=1e-6), "mismatch vs reference (batch=1)"

    # batch % 16 != 0: exercises the (batch, 40) view + partial last block.
    x100 = jax.random.uniform(jax.random.PRNGKey(2), (100, 1, 1, 40),
                              dtype=jnp.float32)
    y100 = attribute_classifier_forward(x100)
    jax.block_until_ready(y100)
    ref100 = 2.0 * jnp.squeeze(x100) - 1.0
    assert y100.shape == ref100.shape == (100, 40)
    assert jnp.allclose(y100, ref100, atol=1e-6), "mismatch (batch=100)"

    # batch % 16 == 0: lane-dense (rows, 128) path split across two tiles.
    xb = jax.random.uniform(jax.random.PRNGKey(3), (8192, 1, 1, 40),
                            dtype=jnp.float32)
    yb = attribute_classifier_forward(xb)
    jax.block_until_ready(yb)
    refb = 2.0 * jnp.squeeze(xb) - 1.0
    assert yb.shape == refb.shape == (8192, 40)
    assert jnp.allclose(yb, refb, atol=1e-6), "mismatch (batch=8192)"

    # bf16: dtype handled in-kernel (no wrapper casts); ref follows same path.
    xbf = jax.random.uniform(jax.random.PRNGKey(4), (64, 1, 1, 40),
                             dtype=jnp.float32).astype(jnp.bfloat16)
    ybf = attribute_classifier_forward(xbf)
    jax.block_until_ready(ybf)
    refbf = (2.0 * jnp.squeeze(xbf).astype(jnp.float32) - 1.0).astype(
        jnp.bfloat16)
    assert ybf.shape == refbf.shape == (64, 40)
    assert ybf.dtype == jnp.bfloat16
    assert jnp.allclose(ybf.astype(jnp.float32), refbf.astype(jnp.float32),
                        atol=1e-2), "mismatch (bf16)"

    print("KERNEL_OK")
</pallas_src>

<mosaic_0001>
module attributes {stable_mosaic.version = 11 : i64} {
  func.func @_affine_kernel(%arg0: i32, %arg1: memref<2x40xf32, #tpu.memory_space<vmem>>, %arg2: memref<2x40xf32, #tpu.memory_space<vmem>>) attributes {dimension_semantics = [#tpu.dimension_semantics<parallel>], iteration_bounds = array<i64: 1>, scalar_prefetch = 0 : i64, scratch_operands = 0 : i64, tpu.core_type = #tpu.core_type<tc>, window_params = [{transform_indices = @transform_0, window_bounds = array<i64: 2, 40>}, {transform_indices = @transform_1, window_bounds = array<i64: 2, 40>}]} {
    %c0 = arith.constant 0 : index
    %c0_0 = arith.constant 0 : index
    %0 = vector.load %arg1[%c0, %c0_0] : memref<2x40xf32, #tpu.memory_space<vmem>>, vector<2x40xf32>
    %cst = arith.constant 2.000000e+00 : f32
    %1 = vector.broadcast %cst : f32 to vector<2x40xf32>
    %2 = arith.mulf %1, %0 : vector<2x40xf32>
    %cst_1 = arith.constant 1.000000e+00 : f32
    %3 = vector.broadcast %cst_1 : f32 to vector<2x40xf32>
    %4 = arith.subf %2, %3 : vector<2x40xf32>
    %c0_2 = arith.constant 0 : index
    %c0_3 = arith.constant 0 : index
    %5 = vector.load %arg2[%c0_2, %c0_3] : memref<2x40xf32, #tpu.memory_space<vmem>>, vector<2x40xf32>
    tpu.vector_store %arg2[%c0_2, %c0_3], %4 {strides = array<i32>} : memref<2x40xf32, #tpu.memory_space<vmem>>, vector<2x40xf32>,
    return
  }
  func.func @transform_0(%arg0: i32) -> (i32, i32) {
    %c0_i32 = arith.constant 0 : i32
    %c0_i32_0 = arith.constant 0 : i32
    return %arg0, %c0_i32 : i32, i32
  }
  func.func @transform_1(%arg0: i32) -> (i32, i32) {
    %c0_i32 = arith.constant 0 : i32
    %c0_i32_0 = arith.constant 0 : i32
    return %arg0, %c0_i32 : i32, i32
  }
}

</mosaic_0001>

<bundles_post_ra>
// kernel: attribute_classifier_forward.1
= control target key start
LH: loop header
LB: loop body
LE: loop exit
PB: predicated region body
PF: predicated region fallthrough
CT: control target
= control target key end

     0   :  { %s80_s0 = inlined_call_operand.vmem [shape: f32[2,40], index: 0, kind: input, shape index: {}]   ;;  %s81_s1 = inlined_call_operand.hbm [shape: f32[2,40], index: 1, kind: output, shape index: {}]  }
   0x1   :  { %v9_v0 = vld [vmem:[%s80_s0] sm:$0x3] }
   0x2   :  { %6 = vsyncpa [#allocation3], 0  ;;  %v10_v1 = vmul.f32 2.0, %v9_v0  ;;  %s54_s8 = smov [#allocation2]   ;;  %vm12_vm0 = vcmask 320512  }
   0x3   :  { %s20_s9 = sshll.u32 %s54_s8, 4  ;;  %s21_s9 = int_to_ptr.vmem [resolvable:$true] %s20_s9 }
   0x4   :  { %v28_v2 = vadd.f32 -1.0, %v10_v1  ;;  %s30_s10 = scalar_lea.vmem %s21_s9, 32  ;;  %p35_p1 = scmp.lt.s32.totalorder %s21_s9, %s21_s9 }
   0x5   :  { %p31_p0 = scmp.ne.s32.totalorder %s21_s9, %s30_s10  ;;  %p36_p2 = scmp.lt.s32.totalorder %s30_s10, %s30_s10 }
   0x6   :  { %13 = vst.msk [vmem:[#allocation2] sm:$0x3] %vm12_vm0, %v28_v2 }
   0x7   :  { %p37_p3 = por %p36_p2, %p35_p1 }
   0x9   :  { %p38_p4 = pnand %p37_p3, %p31_p0 }
   0xb   :  { %41 = shalt.err (!%p38_p4)
}
   0xc   :  { %s42_s13 = scalar_lea.hbm %s81_s1, 32 }
   0xd   :  { %p43_p5 = scmp.ne.s32.totalorder %s81_s1, %s42_s13  ;;  %p46_p6 = scmp.lt.u32.totalorder %s42_s13, %s81_s1 }
   0xf   :  { %p48_p7 = pnand %p46_p6, %p43_p5 }
  0x11   :  { %51 = shalt.err (!%p48_p7)
}
  0x12   :  { %23 = dma.vmem_to_hbm [thread:$0]  %s21_s9, 32, %s81_s1, [#allocation3]  }
  0x13   :  { %52 = dma.done.wait [#allocation3], 32  }
  0x14   :  { %53 = vsyncadd [#allocation3], 4294967264 }
  0x15   :  { %27 = vsyncpa [#allocation3], 1 }

</bundles_post_ra>
